<compile_context>
chip_gen: v7x
topology: tpu7x:2x2x1
jax: 0.10.0
libtpu: 0.0.40
codegen_flags: <defaults>
</compile_context>

<pallas_src>
import functools

import jax
import jax.numpy as jnp
from jax.experimental import pallas as pl
from jax.experimental.pallas import tpu as pltpu


def _round_up(x, m):
    return (x + m - 1) // m * m


def _forward_kernel(s_ref, a_ref, w1s_ref, w1a_ref, b1_ref,
                    w2_ref, b2_ref, w3_ref, b3_ref, o_ref):
    # Layer 1: split matmul replaces cat([s, a]) @ w1 (no lane concat/relayout).
    h1 = (jnp.dot(s_ref[...], w1s_ref[...], preferred_element_type=jnp.float32)
          + jnp.dot(a_ref[...], w1a_ref[...], preferred_element_type=jnp.float32)
          + b1_ref[...])
    h1 = jnp.maximum(h1, 0.0)

    # Layer 2: Linear(128, 64) + ReLU
    h2 = jnp.dot(h1, w2_ref[...], preferred_element_type=jnp.float32) + b2_ref[...]
    h2 = jnp.maximum(h2, 0.0)

    # Layer 3: Linear(64, f_dim) -- unpadded, written straight out.
    o_ref[...] = (jnp.dot(h2, w3_ref[...], preferred_element_type=jnp.float32)
                  + b3_ref[...]).astype(o_ref.dtype)
    # TODO(synk): fuse the ICM forward-loss reduction (||phi(s') - pred||^2)
    # here (phi(s') as an extra batch-tiled input, per-tile partial-sum output)
    # so the prediction never round-trips to HBM when only the loss is needed.


def prepare_params(params, f_dim):
    """One-time weight prep (hoisted out of the per-step hot path).

    Splits the first-layer weight so the kernel never concatenates along lanes.
    params: w1 (f_dim+a_dim,128), b1 (1,128), w2 (128,64), b2 (1,64),
            w3 (64,f_dim), b3 (1,f_dim)  -- all f32, (in, out) layout.
    """
    w1 = params["w1"]
    return {
        "w1_s": w1[:f_dim],        # (f_dim, 128)
        "w1_a": w1[f_dim:],        # (a_dim, 128)
        "b1": params["b1"],
        "w2": params["w2"],
        "b2": params["b2"],
        "w3": params["w3"],
        "b3": params["b3"],
    }


def forward_model(state_encoded, action, prepped, block_b=1024):
    """ForwardModel MLP with a single batch-tiled Pallas kernel call.

    state_encoded: (B, f_dim) f32
    action:        (B, a_dim) f32
    prepped:       output of prepare_params()
    """
    B, f_dim = state_encoded.shape
    a_dim = action.shape[1]
    w1_s, w1_a, b1 = prepped["w1_s"], prepped["w1_a"], prepped["b1"]
    w2, b2 = prepped["w2"], prepped["b2"]
    w3, b3 = prepped["w3"], prepped["b3"]

    # --- Batch tiling -------------------------------------------------------
    # Kernel is per-step-overhead / HBM-bound: use big row tiles (default 1024,
    # cap 2048; ~3 MiB VMEM worst case), but keep >= 2 grid steps whenever the
    # batch allows it so v7x megacore can shard across both TensorCores.
    block_b = max(8, _round_up(min(int(block_b), 2048), 8))
    B8 = _round_up(B, 8)
    target = min(block_b, max(8, _round_up((B8 + 1) // 2, 8)))
    tm = 8
    for t in range(target, 7, -8):          # largest mult-of-8 divisor <= target
        if B8 % t == 0:
            tm = t
            break

    # Pad inputs only when B is not already a multiple of 8 (avoids wrapper
    # copy round-trips in the common aligned case).
    if B8 != B:
        s_in = jnp.zeros((B8, f_dim), state_encoded.dtype).at[:B].set(state_encoded)
        a_in = jnp.zeros((B8, a_dim), action.dtype).at[:B].set(action)
    else:
        s_in, a_in = state_encoded, action

    grid = (B8 // tm,)

    # Weights/biases: full-extent blocks, constant index_map -> VMEM-resident.
    def const(arr):
        return pl.BlockSpec(arr.shape, lambda i: (0,) * arr.ndim)

    out = pl.pallas_call(
        _forward_kernel,
        out_shape=jax.ShapeDtypeStruct((B8, f_dim), jnp.float32),
        grid=grid,
        in_specs=[
            pl.BlockSpec((tm, f_dim), lambda i: (i, 0)),   # state tile
            pl.BlockSpec((tm, a_dim), lambda i: (i, 0)),   # action tile
            const(w1_s), const(w1_a), const(b1),
            const(w2), const(b2), const(w3), const(b3),
        ],
        out_specs=pl.BlockSpec((tm, f_dim), lambda i: (i, 0)),
        compiler_params=pltpu.CompilerParams(
            dimension_semantics=("parallel",)),            # megacore on v7x
    )(s_in, a_in, w1_s, w1_a, b1, w2, b2, w3, b3)

    return out[:B] if B8 != B else out


def init_params(key, f_dim, a_dim):
    """Deterministic synthetic parameters (PyTorch Linear init, pre-transposed)."""
    in_dim = f_dim + a_dim
    ks = jax.random.split(key, 6)

    def lin(kw, kb, fan_in, fan_out):
        bound = 1.0 / jnp.sqrt(fan_in)
        # stored as (in, out) = transpose of torch's (out, in)
        w = jax.random.uniform(kw, (fan_in, fan_out), jnp.float32, -bound, bound)
        b = jax.random.uniform(kb, (1, fan_out), jnp.float32, -bound, bound)
        return w, b

    w1, b1 = lin(ks[0], ks[1], in_dim, 128)
    w2, b2 = lin(ks[2], ks[3], 128, 64)
    w3, b3 = lin(ks[4], ks[5], 64, f_dim)
    return {"w1": w1, "b1": b1, "w2": w2, "b2": b2, "w3": w3, "b3": b3}


def forward_model_ref(state_encoded, action, params):
    """Pure-JAX f32 reference (matches the PyTorch forward)."""
    hp = jax.lax.Precision.HIGHEST
    x = jnp.concatenate([state_encoded, action], axis=-1)
    h1 = jnp.maximum(jnp.dot(x, params["w1"], precision=hp) + params["b1"], 0.0)
    h2 = jnp.maximum(jnp.dot(h1, params["w2"], precision=hp) + params["b2"], 0.0)
    return jnp.dot(h2, params["w3"], precision=hp) + params["b3"]


if __name__ == "__main__":
    key = jax.random.PRNGKey(0)
    f_dim, a_dim = 32, 4
    k_s, k_a, k_p = jax.random.split(key, 3)
    params = init_params(k_p, f_dim, a_dim)
    prepped = prepare_params(params, f_dim)            # one-time weight prep

    fwd = jax.jit(functools.partial(forward_model, block_b=1024))

    # Small aligned batch (single tile, no padding copies).
    B = 8
    state_encoded = jax.random.normal(k_s, (B, f_dim), jnp.float32)
    action = jax.random.normal(k_a, (B, a_dim), jnp.float32)
    out = jax.block_until_ready(fwd(state_encoded, action, prepped))
    ref = forward_model_ref(state_encoded, action, params)
    assert out.shape == (B, f_dim)
    assert jnp.allclose(out, ref, atol=1e-2, rtol=1e-2), "mismatch vs reference (B=8)"

    # Ragged batch: exercises the pad path and a >=2-step grid (megacore path).
    B2 = 300
    s2 = jax.random.normal(jax.random.PRNGKey(1), (B2, f_dim), jnp.float32)
    a2 = jax.random.normal(jax.random.PRNGKey(2), (B2, a_dim), jnp.float32)
    out2 = jax.block_until_ready(fwd(s2, a2, prepped))
    ref2 = forward_model_ref(s2, a2, params)
    assert out2.shape == (B2, f_dim)
    assert jnp.allclose(out2, ref2, atol=1e-2, rtol=1e-2), "mismatch vs reference (B=300)"

    print("KERNEL_OK")
</pallas_src>

<mosaic_0001>
module attributes {stable_mosaic.version = 11 : i64} {
  func.func @_forward_kernel(%arg0: i32, %arg1: memref<8x32xf32, #tpu.memory_space<vmem>>, %arg2: memref<8x4xf32, #tpu.memory_space<vmem>>, %arg3: memref<32x128xf32, #tpu.memory_space<vmem>>, %arg4: memref<4x128xf32, #tpu.memory_space<vmem>>, %arg5: memref<1x128xf32, #tpu.memory_space<vmem>>, %arg6: memref<128x64xf32, #tpu.memory_space<vmem>>, %arg7: memref<1x64xf32, #tpu.memory_space<vmem>>, %arg8: memref<64x32xf32, #tpu.memory_space<vmem>>, %arg9: memref<1x32xf32, #tpu.memory_space<vmem>>, %arg10: memref<8x32xf32, #tpu.memory_space<vmem>>) attributes {dimension_semantics = [#tpu.dimension_semantics<parallel>], iteration_bounds = array<i64: 1>, scalar_prefetch = 0 : i64, scratch_operands = 0 : i64, tpu.core_type = #tpu.core_type<tc>, window_params = [{transform_indices = @transform_0, window_bounds = array<i64: 8, 32>}, {transform_indices = @transform_1, window_bounds = array<i64: 8, 4>}, {pipeline_mode = #tpu.pipeline_mode<synchronous>, transform_indices = @transform_2, window_bounds = array<i64: 32, 128>}, {pipeline_mode = #tpu.pipeline_mode<synchronous>, transform_indices = @transform_3, window_bounds = array<i64: 4, 128>}, {pipeline_mode = #tpu.pipeline_mode<synchronous>, transform_indices = @transform_4, window_bounds = array<i64: 1, 128>}, {pipeline_mode = #tpu.pipeline_mode<synchronous>, transform_indices = @transform_5, window_bounds = array<i64: 128, 64>}, {pipeline_mode = #tpu.pipeline_mode<synchronous>, transform_indices = @transform_6, window_bounds = array<i64: 1, 64>}, {pipeline_mode = #tpu.pipeline_mode<synchronous>, transform_indices = @transform_7, window_bounds = array<i64: 64, 32>}, {pipeline_mode = #tpu.pipeline_mode<synchronous>, transform_indices = @transform_8, window_bounds = array<i64: 1, 32>}, {transform_indices = @transform_9, window_bounds = array<i64: 8, 32>}]} {
    %c0 = arith.constant 0 : index
    %c0_0 = arith.constant 0 : index
    %0 = vector.load %arg1[%c0, %c0_0] : memref<8x32xf32, #tpu.memory_space<vmem>>, vector<8x32xf32>
    %c0_1 = arith.constant 0 : index
    %c0_2 = arith.constant 0 : index
    %1 = vector.load %arg3[%c0_1, %c0_2] : memref<32x128xf32, #tpu.memory_space<vmem>>, vector<32x128xf32>
    %cst = arith.constant dense<0.000000e+00> : vector<8x128xf32>
    %2 = tpu.matmul %0, %1, %cst {dimension_numbers = #tpu.dot_dimension_numbers<[1], [0], [0], [1], [0, 0, 1, 1], [], []>} : vector<8x32xf32>, vector<32x128xf32>, vector<8x128xf32> -> vector<8x128xf32>
    %c0_3 = arith.constant 0 : index
    %c0_4 = arith.constant 0 : index
    %3 = vector.load %arg2[%c0_3, %c0_4] : memref<8x4xf32, #tpu.memory_space<vmem>>, vector<8x4xf32>
    %c0_5 = arith.constant 0 : index
    %c0_6 = arith.constant 0 : index
    %4 = vector.load %arg4[%c0_5, %c0_6] : memref<4x128xf32, #tpu.memory_space<vmem>>, vector<4x128xf32>
    %cst_7 = arith.constant dense<0.000000e+00> : vector<8x128xf32>
    %5 = tpu.matmul %3, %4, %cst_7 {dimension_numbers = #tpu.dot_dimension_numbers<[1], [0], [0], [1], [0, 0, 1, 1], [], []>} : vector<8x4xf32>, vector<4x128xf32>, vector<8x128xf32> -> vector<8x128xf32>
    %6 = arith.addf %2, %5 : vector<8x128xf32>
    %c0_8 = arith.constant 0 : index
    %c0_9 = arith.constant 0 : index
    %7 = vector.load %arg5[%c0_8, %c0_9] : memref<1x128xf32, #tpu.memory_space<vmem>>, vector<1x128xf32>
    %8 = vector.broadcast %7 : vector<1x128xf32> to vector<8x128xf32>
    %9 = arith.addf %6, %8 : vector<8x128xf32>
    %cst_10 = arith.constant 0.000000e+00 : f32
    %10 = vector.broadcast %cst_10 : f32 to vector<8x128xf32>
    %11 = arith.maximumf %9, %10 : vector<8x128xf32>
    %c0_11 = arith.constant 0 : index
    %c0_12 = arith.constant 0 : index
    %12 = vector.load %arg6[%c0_11, %c0_12] : memref<128x64xf32, #tpu.memory_space<vmem>>, vector<128x64xf32>
    %cst_13 = arith.constant dense<0.000000e+00> : vector<8x64xf32>
    %13 = tpu.matmul %11, %12, %cst_13 {dimension_numbers = #tpu.dot_dimension_numbers<[1], [0], [0], [1], [0, 0, 1, 1], [], []>} : vector<8x128xf32>, vector<128x64xf32>, vector<8x64xf32> -> vector<8x64xf32>
    %c0_14 = arith.constant 0 : index
    %c0_15 = arith.constant 0 : index
    %14 = vector.load %arg7[%c0_14, %c0_15] : memref<1x64xf32, #tpu.memory_space<vmem>>, vector<1x64xf32>
    %15 = vector.broadcast %14 : vector<1x64xf32> to vector<8x64xf32>
    %16 = arith.addf %13, %15 : vector<8x64xf32>
    %cst_16 = arith.constant 0.000000e+00 : f32
    %17 = vector.broadcast %cst_16 : f32 to vector<8x64xf32>
    %18 = arith.maximumf %16, %17 : vector<8x64xf32>
    %c0_17 = arith.constant 0 : index
    %c0_18 = arith.constant 0 : index
    %19 = vector.load %arg8[%c0_17, %c0_18] : memref<64x32xf32, #tpu.memory_space<vmem>>, vector<64x32xf32>
    %cst_19 = arith.constant dense<0.000000e+00> : vector<8x32xf32>
    %20 = tpu.matmul %18, %19, %cst_19 {dimension_numbers = #tpu.dot_dimension_numbers<[1], [0], [0], [1], [0, 0, 1, 1], [], []>} : vector<8x64xf32>, vector<64x32xf32>, vector<8x32xf32> -> vector<8x32xf32>
    %c0_20 = arith.constant 0 : index
    %c0_21 = arith.constant 0 : index
    %21 = vector.load %arg9[%c0_20, %c0_21] : memref<1x32xf32, #tpu.memory_space<vmem>>, vector<1x32xf32>
    %22 = vector.broadcast %21 : vector<1x32xf32> to vector<8x32xf32>
    %23 = arith.addf %20, %22 : vector<8x32xf32>
    %c0_22 = arith.constant 0 : index
    %c0_23 = arith.constant 0 : index
    %24 = vector.load %arg10[%c0_22, %c0_23] : memref<8x32xf32, #tpu.memory_space<vmem>>, vector<8x32xf32>
    tpu.vector_store %arg10[%c0_22, %c0_23], %23 {strides = array<i32>} : memref<8x32xf32, #tpu.memory_space<vmem>>, vector<8x32xf32>,
    return
  }
  func.func @transform_0(%arg0: i32) -> (i32, i32) {
    %c0_i32 = arith.constant 0 : i32
    %c0_i32_0 = arith.constant 0 : i32
    return %arg0, %c0_i32 : i32, i32
  }
  func.func @transform_1(%arg0: i32) -> (i32, i32) {
    %c0_i32 = arith.constant 0 : i32
    %c0_i32_0 = arith.constant 0 : i32
    return %arg0, %c0_i32 : i32, i32
  }
  func.func @transform_2(%arg0: i32) -> (i32, i32) {
    %c0_i32 = arith.constant 0 : i32
    %c0_i32_0 = arith.constant 0 : i32
    %c0_i32_1 = arith.constant 0 : i32
    return %c0_i32, %c0_i32_0 : i32, i32
  }
  func.func @transform_3(%arg0: i32) -> (i32, i32) {
    %c0_i32 = arith.constant 0 : i32
    %c0_i32_0 = arith.constant 0 : i32
    %c0_i32_1 = arith.constant 0 : i32
    return %c0_i32, %c0_i32_0 : i32, i32
  }
  func.func @transform_4(%arg0: i32) -> (i32, i32) {
    %c0_i32 = arith.constant 0 : i32
    %c0_i32_0 = arith.constant 0 : i32
    %c0_i32_1 = arith.constant 0 : i32
    return %c0_i32, %c0_i32_0 : i32, i32
  }
  func.func @transform_5(%arg0: i32) -> (i32, i32) {
    %c0_i32 = arith.constant 0 : i32
    %c0_i32_0 = arith.constant 0 : i32
    %c0_i32_1 = arith.constant 0 : i32
    return %c0_i32, %c0_i32_0 : i32, i32
  }
  func.func @transform_6(%arg0: i32) -> (i32, i32) {
    %c0_i32 = arith.constant 0 : i32
    %c0_i32_0 = arith.constant 0 : i32
    %c0_i32_1 = arith.constant 0 : i32
    return %c0_i32, %c0_i32_0 : i32, i32
  }
  func.func @transform_7(%arg0: i32) -> (i32, i32) {
    %c0_i32 = arith.constant 0 : i32
    %c0_i32_0 = arith.constant 0 : i32
    %c0_i32_1 = arith.constant 0 : i32
    return %c0_i32, %c0_i32_0 : i32, i32
  }
  func.func @transform_8(%arg0: i32) -> (i32, i32) {
    %c0_i32 = arith.constant 0 : i32
    %c0_i32_0 = arith.constant 0 : i32
    %c0_i32_1 = arith.constant 0 : i32
    return %c0_i32, %c0_i32_0 : i32, i32
  }
  func.func @transform_9(%arg0: i32) -> (i32, i32) {
    %c0_i32 = arith.constant 0 : i32
    %c0_i32_0 = arith.constant 0 : i32
    return %arg0, %c0_i32 : i32, i32
  }
}

</mosaic_0001>

<bundles_post_ra>
// kernel: forward_model.1
= control target key start
LH: loop header
LB: loop body
LE: loop exit
PB: predicated region body
PF: predicated region fallthrough
CT: control target
= control target key end

     0   :  { %vm44_vm0 = vcmask 1043456   ;;  %v579_v2 = vmov 0.0   ;;  %vm580_vm1 = vmmov 0   ;;  %vm40_vm2 = vcmask 31744   ;;  %s767_s0 = inlined_call_operand.vmem [shape: f32[8,32], index: 0, kind: input, shape index: {}]   ;;  %s768_s1 = inlined_call_operand.vmem [shape: f32[8,4], index: 1, kind: input, shape index: {}]   ;;  %s769_s2 = inlined_call_operand.vmem [shape: f32[32,128], index: 2, kind: input, shape index: {}]   ;;  %s770_s3 = inlined_call_operand.vmem [shape: f32[4,128], index: 3, kind: input, shape index: {}]   ;;  %s771_s4 = inlined_call_operand.vmem [shape: f32[1,128], index: 4, kind: input, shape index: {}]   ;;  %s772_s5 = inlined_call_operand.vmem [shape: f32[128,64], index: 5, kind: input, shape index: {}]   ;;  %s773_s6 = inlined_call_operand.vmem [shape: f32[1,64], index: 6, kind: input, shape index: {}]   ;;  %s774_s7 = inlined_call_operand.vmem [shape: f32[64,32], index: 7, kind: input, shape index: {}]   ;;  %s775_s8 = inlined_call_operand.vmem [shape: f32[1,32], index: 8, kind: input, shape index: {}]   ;;  %s776_s9 = inlined_call_operand.hbm [shape: f32[8,32], index: 9, kind: output, shape index: {}]  }
   0x1   :  { %v39_v0 = vld [vmem:[%s770_s3] sm:$0xf]  ;;  %439 = vmatprep.subr.mxu1 %v579_v2  ;;  %441 = vmatprep.mubr.msk.f32.mxu1 %vm580_vm1, %v579_v2  ;;  %v35_v4 = vld [vmem:[%s769_s2 + $0x8] sm:$0xff]  ;;  %v36_v5 = vld [vmem:[%s769_s2 + $0x10] sm:$0xff]  ;;  %v581_v8 = vmov 0.0|0.0  }
   0x2   :  { %v38_v1 = vld [vmem:[%s768_s1] sm:$0xff]  ;;  %440 = vmatpush3.msk.msra.mxu1 %vm44_vm0, %v39_v0  ;;  %v37_v7 = vld [vmem:[%s769_s2 + $0x18] sm:$0xff]  ;;  %515 = vmatprep.subr.bf16.mxu0 %v581_v8  ;;  %v202_v10 = vld [vmem:[%s772_s5 + $0x8] sm:$0xff] }
   0x3   :  { %v34_v3 = vld [vmem:[%s769_s2] sm:$0xff]  ;;  %442 = vmatmul.mubr.msk.f32.vlgmr.msra.gmra.mrb[0].mxu1 %vm40_vm2, %v38_v1  ;;  %509 = vmatprep.subr.bf16.mxu1 %v581_v8  ;;  %v203_v11 = vld [vmem:[%s772_s5 + $0x10] sm:$0xff]  ;;  %v204_v12 = vld [vmem:[%s772_s5 + $0x18] sm:$0xff]  ;;  %v513_v13 = vpack.c.bf16 %v37_v7, %v36_v5 }
   0x4   :  { %v510_v6 = vpack.c.bf16 %v35_v4, %v34_v3  ;;  %v201_v9 = vld [vmem:[%s772_s5] sm:$0xff]  ;;  %452 = vmatprep.mubr.msk.f32.mxu1 %vm580_vm1, %v579_v2  ;;  %487 = vmatprep.mubr.msk.f32.mxu0 %vm580_vm1, %v579_v2 }
   0x5   :  { %v516_v14 = vpack.c.bf16 %v202_v10, %v201_v9 }
   0x6   :  { %511 = vmatpush3.bf16.msra.mxu1 %v510_v6 }
   0x7   :  { %512 = vmatprep.subr.bf16.mxu1 %v581_v8 }
   0x8   :  { %14 = vsyncpa [#allocation3], 0  ;;  %517 = vmatpush3.bf16.msra.mxu0 %v516_v14  ;;  %v519_v15 = vpack.c.bf16 %v204_v12, %v203_v11  ;;  %v205_v16 = vld [vmem:[%s772_s5 + $0x20] sm:$0xff]  ;;  %v206_v17 = vld [vmem:[%s772_s5 + $0x28] sm:$0xff]  ;;  %vm118_vm3 = vcmask 261120   ;;  %vm310_vm4 = vcmask 523264  }
   0x9   :  { %518 = vmatprep.subr.bf16.mxu0 %v581_v8  ;;  %v33_v18 = vld [vmem:[%s767_s0] sm:$0xff]  ;;  %v522_v19 = vpack.c.bf16 %v206_v17, %v205_v16  ;;  %v207_v20 = vld [vmem:[%s772_s5 + $0x30] sm:$0xff]  ;;  %v208_v21 = vld [vmem:[%s772_s5 + $0x38] sm:$0xff]  ;;  %s582_s23 = smov [#allocation2]  }
   0xa   :  { %514 = vmatpush3.bf16.msra.mxu1 %v513_v13  ;;  %v525_v22 = vpack.c.bf16 %v208_v21, %v207_v20  ;;  %v209_v23 = vld [vmem:[%s772_s5 + $0x40] sm:$0xff]  ;;  %v210_v24 = vld [vmem:[%s772_s5 + $0x48] sm:$0xff]  ;;  %v211_v26 = vld [vmem:[%s772_s5 + $0x50] sm:$0xff]  ;;  %s391_s24 = sshll.u32 %s582_s23, 4  ;;  %s392_s24 = int_to_ptr.vmem [resolvable:$true] %s391_s24 }
   0xb   :  { %539 = vmatprep.subr.bf16.mxu1 %v581_v8  ;;  %v528_v25 = vpack.c.bf16 %v210_v24, %v209_v23  ;;  %v212_v27 = vld [vmem:[%s772_s5 + $0x58] sm:$0xff]  ;;  %v213_v29 = vld [vmem:[%s772_s5 + $0x60] sm:$0xff]  ;;  %v214_v30 = vld [vmem:[%s772_s5 + $0x68] sm:$0xff]  ;;  %p560_p1 = scmp.lt.s32.totalorder %s392_s24, %s392_s24 }
   0xc   :  { %520 = vmatpush3.bf16.msra.mxu0 %v519_v15  ;;  %v531_v28 = vpack.c.bf16 %v212_v27, %v211_v26  ;;  %v534_v31 = vpack.c.bf16 %v214_v30, %v213_v29  ;;  %v215_v32 = vld [vmem:[%s772_s5 + $0x70] sm:$0xff]  ;;  %v216_v33 = vld [vmem:[%s772_s5 + $0x78] sm:$0xff]  ;;  %v295_v35 = vld [vmem:[%s774_s7] sm:$0xff] }
   0xd   :  { %453 = vmatmul.mubr.msk.f32.vlgmr.msra.gmra.mrb[2].mxu1 %vm118_vm3, %v33_v18  ;;  %521 = vmatprep.subr.bf16.mxu0 %v581_v8  ;;  %v537_v34 = vpack.c.bf16 %v216_v33, %v215_v32  ;;  %v296_v36 = vld [vmem:[%s774_s7 + $0x8] sm:$0xff]  ;;  %v297_v37 = vld [vmem:[%s774_s7 + $0x10] sm:$0xff]  ;;  %v298_v39 = vld [vmem:[%s774_s7 + $0x18] sm:$0xff] }
   0xe   :  { %506 = vmatprep.mubr.msk.f32.mxu1 %vm580_vm1, %v579_v2  ;;  %v540_v38 = vpack.c.bf16 %v296_v36, %v295_v35  ;;  %v543_v40 = vpack.c.bf16 %v298_v39, %v297_v37  ;;  %v299_v41 = vld [vmem:[%s774_s7 + $0x20] sm:$0xff]  ;;  %v300_v42 = vld [vmem:[%s774_s7 + $0x28] sm:$0xff]  ;;  %v301_v52 = vld [vmem:[%s774_s7 + $0x30] sm:$0xff] }
   0xf   :  { %v546_v43 = vpack.c.bf16 %v300_v42, %v299_v41  ;;  %v402_v47 = vld [vmem:[%s771_s4] ss:$0 sm:$0xff]  ;;  %v302_v53 = vld [vmem:[%s774_s7 + $0x38] sm:$0xff]  ;;  %s555_s7 = scalar_lea.vmem %s392_s24, 128 }
  0x10   :  { %523 = vmatpush3.bf16.msra.mxu0 %v522_v19  ;;  %541 = vmatpush3.bf16.msra.mxu1 %v540_v38  ;;  %v549_v54 = vpack.c.bf16 %v302_v53, %v301_v52  ;;  %v403_v55 = vld [vmem:[%s773_s6] ss:$0 sm:$0xff]  ;;  %p556_p0 = scmp.ne.s32.totalorder %s392_s24, %s555_s7  ;;  %p561_p2 = scmp.lt.s32.totalorder %s555_s7, %s555_s7 }
  0x11   :  { %524 = vmatprep.subr.bf16.mxu0 %v581_v8  ;;  %542 = vmatprep.subr.bf16.mxu1 %v581_v8  ;;  %v404_v60 = vld [vmem:[%s775_s8] ss:$0 sm:$0xff] }
  0x12   :  { %p562_p3 = por %p561_p2, %p560_p1 }
  0x14   :  { %526 = vmatpush3.bf16.msra.mxu0 %v525_v22  ;;  %544 = vmatpush3.bf16.msra.mxu1 %v543_v40  ;;  %p563_p4 = pnand %p562_p3, %p556_p0 }
  0x15   :  { %527 = vmatprep.subr.bf16.mxu0 %v581_v8  ;;  %545 = vmatprep.subr.bf16.mxu1 %v581_v8 }
  0x18   :  { %529 = vmatpush3.bf16.msra.mxu0 %v528_v25  ;;  %547 = vmatpush3.bf16.msra.mxu1 %v546_v43 }
  0x19   :  { %530 = vmatprep.subr.bf16.mxu0 %v581_v8  ;;  %548 = vmatprep.subr.bf16.mxu1 %v581_v8 }
  0x1c   :  { %532 = vmatpush3.bf16.msra.mxu0 %v531_v28  ;;  %550 = vmatpush3.bf16.msra.mxu1 %v549_v54 }
  0x1d   :  { %533 = vmatprep.subr.bf16.mxu0 %v581_v8 }
  0x20   :  { %535 = vmatpush3.bf16.msra.mxu0 %v534_v31 }
  0x21   :  { %536 = vmatprep.subr.bf16.mxu0 %v581_v8 }
  0x24   :  { %538 = vmatpush3.bf16.msra.mxu0 %v537_v34 }
  0xd6   :  { %v114_v44 = vpop.f32.mrb[0].mxu1 }
  0xd7   :  { %v443_v45 = vpop.f32.mrb[1].mxu1 }
  0xe0   :  { %v188_v46 = vpop.f32.mrb[2].mxu1 }
  0xe1   :  { %v189_v48 = vadd.f32 %v188_v46, %v114_v44  ;;  %v454_v49 = vpop.f32.mrb[3].mxu1 }
  0xe3   :  { %v199_v50 = vadd.f32 %v402_v47, %v189_v48 }
  0xe5   :  { %v200_v51 = vmax.f32 %v199_v50, 0.0 }
  0xe7   :  { %488 = vmatmul.mubr.f32.vlgmr.msra.gmra.mrb[0].mxu0 %v200_v51 }
 0x1ba   :  { %v290_v56 = vpop.f32.mrb[0].mxu0 }
 0x1bb   :  { %v291_v57 = vadd.f32 %v403_v55, %v290_v56  ;;  %v489_v58 = vpop.f32.mrb[1].mxu0 }
 0x1bd   :  { %v294_v59 = vmax.f32 %v291_v57, 0.0 }
 0x1bf   :  { %507 = vmatmul.mubr.msk.f32.vlgmr.msra.gmra.mrb[4].mxu1 %vm310_vm4, %v294_v59 }
 0x292   :  { %v380_v61 = vpop.f32.mrb[4].mxu1 }
 0x293   :  { %v381_v62 = vadd.f32 %v404_v60, %v380_v61  ;;  %v508_v63 = vpop.f32.mrb[5].mxu1 }
 0x295   :  { %384 = vst.msk [vmem:[#allocation2] sm:$0xff] %vm118_vm3, %v381_v62 }
 0x296   :  { %566 = shalt.err (!%p563_p4)
}
 0x297   :  { %s567_s2 = scalar_lea.hbm %s776_s9, 128 }
 0x298   :  { %p568_p5 = scmp.ne.s32.totalorder %s776_s9, %s567_s2  ;;  %p571_p6 = scmp.lt.u32.totalorder %s567_s2, %s776_s9 }
 0x29a   :  { %p573_p7 = pnand %p571_p6, %p568_p5 }
 0x29c   :  { %576 = shalt.err (!%p573_p7)
}
 0x29d   :  { %394 = dma.vmem_to_hbm [thread:$0]  %s392_s24, 128, %s776_s9, [#allocation3]  }
 0x29e   :  { %577 = dma.done.wait [#allocation3], 128  }
 0x29f   :  { %578 = vsyncadd [#allocation3], 4294967168 }
 0x2a0   :  { %398 = vsyncpa [#allocation3], 1 }

</bundles_post_ra>
